<compile_context>
chip_gen: v5e
topology: v5e:2x2
jax: 0.10.0
libtpu: 0.0.40
codegen_flags: <defaults>
</compile_context>

<pallas_src>
import jax
import jax.numpy as jnp
from jax.experimental import pallas as pl
from jax.experimental.pallas import tpu as pltpu


def _attn_kernel(x_ref, wq_ref, wk_ref, wv_ref, o_ref):
    # x_ref: (bb, S, D) block of the batch; weights: (S, D), broadcast over batch.
    x = x_ref[...]                         # (bb, S, D)
    q = wq_ref[...][None, :, :] * x        # VPU elementwise
    k = wk_ref[...][None, :, :] * x
    v = wv_ref[...][None, :, :] * x

    # scores: (bb, S, S) = contract the feature dim of q and k directly
    # (no k.T -> no XLU transpose), f32 accumulation on the MXU.
    s = jnp.einsum("bsd,btd->bst", q, k, preferred_element_type=jnp.float32)
    # out: (bb, S, D) = scores @ v, f32 accumulation.
    out = jnp.einsum("bst,btd->bsd", s, v, preferred_element_type=jnp.float32)

    o_ref[...] = out.astype(o_ref.dtype)


def causal_self_attention(x, wq, wk, wv):
    B, S, D = x.shape
    itemsize = jnp.dtype(x.dtype).itemsize

    # Conservative per-batch-element VMEM working set: x/q/k/v/out tiles plus
    # the f32 (S,S) score tile; weights are shared across the grid.
    per_batch_bytes = 5 * S * D * itemsize + S * S * 4
    weight_bytes = 3 * S * D * itemsize
    vmem_budget = 16 * 1024 * 1024  # headroom for double-buffering / v7x's 64 MiB VMEM

    # Fold the whole batch into one grid step when it fits (amortizes the
    # ~0.35 us per-step overhead); otherwise iterate the batch in parallel.
    bb = B if (B * per_batch_bytes + weight_bytes) <= vmem_budget else 1
    grid = (B // bb,)
    # TODO(synk): for production S where even a single (S,D) slice + f32 (S,S)
    # scores no longer fits VMEM, add flash-style query/kv tiling with an
    # accumulator (zero at k==0, write at k==last) and single-buffered weights.

    return pl.pallas_call(
        _attn_kernel,
        out_shape=jax.ShapeDtypeStruct((B, S, D), x.dtype),
        grid_spec=pl.GridSpec(
            grid=grid,
            in_specs=[
                pl.BlockSpec((bb, S, D), lambda b: (b, 0, 0)),  # x batch block
                pl.BlockSpec((S, D), lambda b: (0, 0)),         # Wq (replicated)
                pl.BlockSpec((S, D), lambda b: (0, 0)),         # Wk
                pl.BlockSpec((S, D), lambda b: (0, 0)),         # Wv
            ],
            out_specs=pl.BlockSpec((bb, S, D), lambda b: (b, 0, 0)),
        ),
        compiler_params=pltpu.CompilerParams(
            dimension_semantics=("parallel",),   # megacore split when grid > 1
        ),
    )(x, wq, wk, wv)


def _reference(x, wq, wk, wv):
    q = wq[None, :, :] * x
    k = wk[None, :, :] * x
    v = wv[None, :, :] * x
    return jnp.einsum("bsd,btd->bst", q, k) @ v


if __name__ == "__main__":
    B, S, D = 2, 8, 32

    key = jax.random.PRNGKey(0)
    kx, kq, kk, kv = jax.random.split(key, 4)

    # Deterministic "parameters" (module __init__ uses randn of shape (S, D))
    wq = jax.random.normal(kq, (S, D), dtype=jnp.float32)
    wk = jax.random.normal(kk, (S, D), dtype=jnp.float32)
    wv = jax.random.normal(kv, (S, D), dtype=jnp.float32)

    x = jax.random.normal(kx, (B, S, D), dtype=jnp.float32)

    out = jax.block_until_ready(causal_self_attention(x, wq, wk, wv))

    ref = _reference(x, wq, wk, wv)
    assert out.shape == (B, S, D)
    assert jnp.allclose(out, ref, atol=1e-4, rtol=1e-4), "mismatch vs reference"

    print("KERNEL_OK")
</pallas_src>

<mosaic_0001>
module attributes {stable_mosaic.version = 11 : i64} {
  func.func @_attn_kernel(%arg0: i32, %arg1: memref<2x8x32xf32, #tpu.memory_space<vmem>>, %arg2: memref<8x32xf32, #tpu.memory_space<vmem>>, %arg3: memref<8x32xf32, #tpu.memory_space<vmem>>, %arg4: memref<8x32xf32, #tpu.memory_space<vmem>>, %arg5: memref<2x8x32xf32, #tpu.memory_space<vmem>>) attributes {dimension_semantics = [#tpu.dimension_semantics<parallel>], iteration_bounds = array<i64: 1>, scalar_prefetch = 0 : i64, scratch_operands = 0 : i64, tpu.core_type = #tpu.core_type<tc>, window_params = [{transform_indices = @transform_0, window_bounds = array<i64: 2, 8, 32>}, {pipeline_mode = #tpu.pipeline_mode<synchronous>, transform_indices = @transform_1, window_bounds = array<i64: 8, 32>}, {pipeline_mode = #tpu.pipeline_mode<synchronous>, transform_indices = @transform_2, window_bounds = array<i64: 8, 32>}, {pipeline_mode = #tpu.pipeline_mode<synchronous>, transform_indices = @transform_3, window_bounds = array<i64: 8, 32>}, {transform_indices = @transform_4, window_bounds = array<i64: 2, 8, 32>}]} {
    %c0 = arith.constant 0 : index
    %c0_0 = arith.constant 0 : index
    %c0_1 = arith.constant 0 : index
    %0 = vector.load %arg1[%c0, %c0_0, %c0_1] : memref<2x8x32xf32, #tpu.memory_space<vmem>>, vector<2x8x32xf32>
    %c0_2 = arith.constant 0 : index
    %c0_3 = arith.constant 0 : index
    %1 = vector.load %arg2[%c0_2, %c0_3] : memref<8x32xf32, #tpu.memory_space<vmem>>, vector<8x32xf32>
    %2 = vector.shape_cast %1 : vector<8x32xf32> to vector<1x8x32xf32>
    %3 = vector.broadcast %2 : vector<1x8x32xf32> to vector<2x8x32xf32>
    %4 = arith.mulf %3, %0 : vector<2x8x32xf32>
    %c0_4 = arith.constant 0 : index
    %c0_5 = arith.constant 0 : index
    %5 = vector.load %arg3[%c0_4, %c0_5] : memref<8x32xf32, #tpu.memory_space<vmem>>, vector<8x32xf32>
    %6 = vector.shape_cast %5 : vector<8x32xf32> to vector<1x8x32xf32>
    %7 = vector.broadcast %6 : vector<1x8x32xf32> to vector<2x8x32xf32>
    %8 = arith.mulf %7, %0 : vector<2x8x32xf32>
    %c0_6 = arith.constant 0 : index
    %c0_7 = arith.constant 0 : index
    %9 = vector.load %arg4[%c0_6, %c0_7] : memref<8x32xf32, #tpu.memory_space<vmem>>, vector<8x32xf32>
    %10 = vector.shape_cast %9 : vector<8x32xf32> to vector<1x8x32xf32>
    %11 = vector.broadcast %10 : vector<1x8x32xf32> to vector<2x8x32xf32>
    %12 = arith.mulf %11, %0 : vector<2x8x32xf32>
    "tpu.trace_start"() <{level = 10 : i32, message = "bsd,btd->bst"}> : () -> ()
    %cst = arith.constant dense<0.000000e+00> : vector<2x8x8xf32>
    %13 = tpu.matmul %4, %8, %cst {dimension_numbers = #tpu.dot_dimension_numbers<[2], [2], [1], [1], [0, 0, 0, 1, 1, 1], [0], [0]>} : vector<2x8x32xf32>, vector<2x8x32xf32>, vector<2x8x8xf32> -> vector<2x8x8xf32>
    "tpu.trace_stop"() : () -> ()
    "tpu.trace_start"() <{level = 10 : i32, message = "bst,btd->bsd"}> : () -> ()
    %cst_8 = arith.constant dense<0.000000e+00> : vector<2x8x32xf32>
    %14 = tpu.matmul %13, %12, %cst_8 {dimension_numbers = #tpu.dot_dimension_numbers<[2], [1], [1], [2], [0, 0, 0, 1, 1, 2], [0], [0]>} : vector<2x8x8xf32>, vector<2x8x32xf32>, vector<2x8x32xf32> -> vector<2x8x32xf32>
    "tpu.trace_stop"() : () -> ()
    %c0_9 = arith.constant 0 : index
    %c0_10 = arith.constant 0 : index
    %c0_11 = arith.constant 0 : index
    %15 = vector.load %arg5[%c0_9, %c0_10, %c0_11] : memref<2x8x32xf32, #tpu.memory_space<vmem>>, vector<2x8x32xf32>
    tpu.vector_store %arg5[%c0_9, %c0_10, %c0_11], %14 {strides = array<i32>} : memref<2x8x32xf32, #tpu.memory_space<vmem>>, vector<2x8x32xf32>,
    return
  }
  func.func @transform_0(%arg0: i32) -> (i32, i32, i32) {
    %c0_i32 = arith.constant 0 : i32
    %c0_i32_0 = arith.constant 0 : i32
    %c0_i32_1 = arith.constant 0 : i32
    return %arg0, %c0_i32, %c0_i32_0 : i32, i32, i32
  }
  func.func @transform_1(%arg0: i32) -> (i32, i32) {
    %c0_i32 = arith.constant 0 : i32
    %c0_i32_0 = arith.constant 0 : i32
    %c0_i32_1 = arith.constant 0 : i32
    return %c0_i32, %c0_i32_0 : i32, i32
  }
  func.func @transform_2(%arg0: i32) -> (i32, i32) {
    %c0_i32 = arith.constant 0 : i32
    %c0_i32_0 = arith.constant 0 : i32
    %c0_i32_1 = arith.constant 0 : i32
    return %c0_i32, %c0_i32_0 : i32, i32
  }
  func.func @transform_3(%arg0: i32) -> (i32, i32) {
    %c0_i32 = arith.constant 0 : i32
    %c0_i32_0 = arith.constant 0 : i32
    %c0_i32_1 = arith.constant 0 : i32
    return %c0_i32, %c0_i32_0 : i32, i32
  }
  func.func @transform_4(%arg0: i32) -> (i32, i32, i32) {
    %c0_i32 = arith.constant 0 : i32
    %c0_i32_0 = arith.constant 0 : i32
    %c0_i32_1 = arith.constant 0 : i32
    return %arg0, %c0_i32, %c0_i32_0 : i32, i32, i32
  }
}

</mosaic_0001>

<bundles_post_ra>
// kernel: tpu_custom_call.1
= control target key start
LH: loop header
LB: loop body
LE: loop exit
PB: predicated region body
PF: predicated region fallthrough
CT: control target
= control target key end

     0   :  { %9 = vsyncpa [#allocation3], 0  ;;  %s409_s0 = inlined_call_operand.hbm [shape: f32[2,8,32], index: 0, kind: input, shape index: {}]   ;;  %s410_s1 = inlined_call_operand.hbm [shape: f32[8,32], index: 1, kind: input, shape index: {}]   ;;  %s411_s2 = inlined_call_operand.hbm [shape: f32[8,32], index: 2, kind: input, shape index: {}]   ;;  %s412_s3 = inlined_call_operand.hbm [shape: f32[8,32], index: 3, kind: input, shape index: {}]   ;;  %s413_s4 = inlined_call_operand.hbm [shape: f32[2,8,32], index: 4, kind: output, shape index: {}]  }
   0x1   :  { %10 = vsyncpa [#allocation6], 0 }
   0x2   :  { %11 = vsyncpa [#allocation9], 0  ;;  %s31_s17 = sshll.u32 %s410_s1, 4  ;;  %s32_s17 = int_to_ptr.hbm [resolvable:$true] %s31_s17 }
   0x3   :  { %12 = vsyncpa [#allocation4], 0  ;;  %s350_s18 = smov [#allocation5]   ;;  %s17_s22 = sshll.u32 %s409_s0, 4  ;;  %s18_s22 = int_to_ptr.hbm [resolvable:$true] %s17_s22 }
   0x4   :  { %s33_s19 = sshll.u32 %s350_s18, 4  ;;  %s351_s23 = smov [#allocation2]   ;;  %s34_s19 = int_to_ptr.vmem [resolvable:$true] %s33_s19 }
   0x5   :  { %36 = dma.hbm_to_vmem [thread:$0]  %s32_s17, 128, %s34_s19, [#allocation6]  }
   0x6   :  { %s19_s24 = sshll.u32 %s351_s23, 4  ;;  %s352_s25 = smov 128   ;;  %s20_s24 = int_to_ptr.vmem [resolvable:$true] %s19_s24 }
   0x7   :  { %s353_s26 = smov 8   ;;  %s42_s28 = sshll.u32 %s411_s2, 4  ;;  %s43_s28 = int_to_ptr.hbm [resolvable:$true] %s42_s28 }
   0x8   :  { %25 = dma.hbm_to_vmem [thread:$0]  %s18_s22, 256, %s20_s24, [#allocation3], %s352_s25, %s352_s25, %s353_s26  }
   0x9   :  { %s354_s29 = smov [#allocation7]   ;;  %s53_s6 = sshll.u32 %s412_s3, 4  ;;  %s54_s6 = int_to_ptr.hbm [resolvable:$true] %s53_s6 }
   0xa   :  { %s44_s30 = sshll.u32 %s354_s29, 4  ;;  %s355_s7 = smov [#allocation8]   ;;  %s45_s30 = int_to_ptr.vmem [resolvable:$true] %s44_s30 }
   0xb   :  { %47 = dma.hbm_to_vmem [thread:$0]  %s43_s28, 128, %s45_s30, [#allocation6]  }
   0xc   :  { %s55_s8 = sshll.u32 %s355_s7, 4  ;;  %s56_s8 = int_to_ptr.vmem [resolvable:$true] %s55_s8 }
   0xd   :  { %58 = dma.hbm_to_vmem [thread:$0]  %s54_s6, 128, %s56_s8, [#allocation9]  }
   0xe   :  { %342 = dma.done.wait [#allocation3], 256  }
   0xf   :  { %343 = vsyncadd [#allocation3], 4294967040 }
  0x10   :  { %344 = dma.done.wait [#allocation6], 256  }
  0x11   :  { %345 = vsyncadd [#allocation6], 4294967040 }
  0x12   :  { %346 = dma.done.wait [#allocation9], 128  }
  0x13   :  { %347 = vsyncadd [#allocation9], 4294967168  ;;  %v75_v0 = vld [vmem:[#allocation2] sm:$0xff]  ;;  %v80_v1 = vld [vmem:[#allocation7] sm:$0xff]  ;;  %vm86_vm0 = vcmask 261120   ;;  %vm139_vm1 = vcmask 64512  }
  0x14   :  { %v76_v2 = vld [vmem:[#allocation2 + $0x8] sm:$0xff]  ;;  %v81_v3 = vmul.f32 %v80_v1, %v75_v0  ;;  %v77_v5 = vld [vmem:[#allocation5] sm:$0xff]  ;;  %v83_v8 = vld [vmem:[#allocation8] sm:$0xff]  ;;  %s356_s2 = smov [#allocation10]   ;;  %s194_s11 = sshll.u32 %s413_s4, 4  ;;  %s195_s11 = int_to_ptr.hbm [resolvable:$true] %s194_s11 }
  0x15   :  { %v82_v4 = vmul.f32 %v80_v1, %v76_v2  ;;  %v78_v6 = vmul.f32 %v77_v5, %v75_v0  ;;  %v79_v7 = vmul.f32 %v77_v5, %v76_v2  ;;  %v84_v9 = vmul.f32 %v83_v8, %v75_v0  ;;  %s192_s3 = sshll.u32 %s356_s2, 4  ;;  %s193_s3 = int_to_ptr.vmem [resolvable:$true] %s192_s3 }
  0x16   :  { %209 = vmatpush.xpose.msk.msra.mxu0 %vm86_vm0, %v81_v3  ;;  %v85_v10 = vmul.f32 %v83_v8, %v76_v2 }
  0x17   :  { %211 = vmatpush.xpose.msk.msra.mxu1 %vm86_vm0, %v82_v4  ;;  %158 = vmatpush.msra.mxu2 %v84_v9 }
  0x18   :  { %181 = vmatpush.msra.mxu3 %v85_v10 }
  0x19   :  { %210 = vmatmul.msk.f32.vlgmr.msra.gmra.mxu0 %vm86_vm0, %v78_v6 }
  0x1a   :  { %212 = vmatmul.msk.f32.vlgmr.msra.gmra.mxu1 %vm86_vm0, %v79_v7 }
  0x96   :  { %v110_v11 = vpop.f32.mrf.mxu0 }
  0x97   :  { %v136_v12 = vpop.f32.mrf.mxu1  ;;  %213 = vmatmul.msk.f32.vlgmr.msra.gmra.mxu2 %vm139_vm1, %v110_v11 }
  0x98   :  { %214 = vmatmul.msk.f32.vlgmr.msra.gmra.mxu3 %vm139_vm1, %v136_v12 }
 0x11a   :  { %v160_v13 = vpop.f32.mrf.mxu2 }
 0x11b   :  { %v183_v14 = vpop.f32.mrf.mxu3  ;;  %186 = vst.msk [vmem:[#allocation10] sm:$0xff] %vm86_vm0, %v160_v13 }
 0x11c   :  { %187 = vst.msk [vmem:[#allocation10 + $0x8] sm:$0xff] %vm86_vm0, %v183_v14 }
 0x11d   :  { %200 = dma.vmem_to_hbm [thread:$0]  %s193_s3, 256, %s195_s11, [#allocation4], %s352_s25, %s352_s25, %s353_s26  }
 0x11e   :  { %348 = dma.done.wait [#allocation4], 256  }
 0x11f   :  { %349 = vsyncadd [#allocation4], 4294967040 }
 0x120   :  { %205 = vsyncpa [#allocation3], 1 }
 0x121   :  { %206 = vsyncpa [#allocation6], 1 }
 0x122   :  { %207 = vsyncpa [#allocation9], 1 }
 0x123   :  { %208 = vsyncpa [#allocation4], 1 }

</bundles_post_ra>
